<compile_context>
chip_gen: v7x
topology: tpu7x:2x2x1
jax: 0.10.0
libtpu: 0.0.40
codegen_flags: <defaults>
</compile_context>

<pallas_src>
import functools

import jax
import jax.numpy as jnp
from jax.experimental import pallas as pl
from jax.experimental.pallas import tpu as pltpu

EPS = 1e-5  # PyTorch InstanceNorm1d default


def _round_up(a, m):
    return (a + m - 1) // m * m


def _shift_cols(v, d):
    """s[:, l] = v[:, l + d] with zeros where out of range (d static)."""
    if d == 0:
        return v
    c = v.shape[0]
    z = jnp.zeros((c, abs(d)), v.dtype)
    if d > 0:
        return jnp.concatenate([v[:, d:], z], axis=1)
    return jnp.concatenate([z, v[:, :d]], axis=1)


def _im2col(v, k, pad):
    """(C, Lp) -> (k*C, Lp): tap-major stack of shifted views ('same' zero pad)."""
    slabs = [_shift_cols(v, t - pad) for t in range(k)]
    return jnp.concatenate(slabs, axis=0)


def residual_kernel(x_ref,
                    wa_ref, ba_ref, ga_ref, bea_ref,
                    wb_ref, bb_ref, gb_ref, beb_ref,
                    out_ref, *, k, pad, L, Cop):
    x = x_ref[0].astype(jnp.float32)                 # (Cip, Lp)
    Lp = x.shape[-1]

    # valid-length mask (padded columns >= L must not enter the statistics)
    col = jax.lax.broadcasted_iota(jnp.int32, (1, Lp), 1)
    lmask = (col < L).astype(jnp.float32)
    inv_L = 1.0 / L

    def inorm(y, gamma, beta):
        # single-pass statistics over the true length L (biased variance)
        ym = y * lmask
        s = jnp.sum(ym, axis=-1, keepdims=True)
        ss = jnp.sum(ym * ym, axis=-1, keepdims=True)
        mean = s * inv_L
        var = jnp.maximum(ss * inv_L - mean * mean, 0.0)
        return (y - mean) * jax.lax.rsqrt(var + EPS) * gamma + beta

    # ---- stage A: fused conv1d_layer + conv_layer_gates (one big matmul) ----
    xa = _im2col(x, k, pad).astype(jnp.bfloat16)              # (k*Cip, Lp)
    ya = jnp.dot(wa_ref[...], xa,
                 preferred_element_type=jnp.float32) + ba_ref[...]
    ya = inorm(ya, ga_ref[...], bea_ref[...])                  # (2*Cop, Lp)
    # GLU; zero the padded columns so they act as zero conv padding for stage B
    glu = (ya[:Cop] * jax.nn.sigmoid(ya[Cop:])) * lmask        # (Cop, Lp)

    # ---- stage B: conv1d_out_layer ----
    xb = _im2col(glu, k, pad).astype(jnp.bfloat16)             # (k*Cop, Lp)
    yb = jnp.dot(wb_ref[...], xb,
                 preferred_element_type=jnp.float32) + bb_ref[...]
    h2 = inorm(yb, gb_ref[...], beb_ref[...])                  # (Cip, Lp)

    out_ref[0] = (x + h2).astype(out_ref.dtype)


def residual_layer(x, params, *, kernel_size, padding):
    """x: (B, Ci, L); params: dict of conv / instance-norm weights."""
    B, Ci, L = x.shape
    k = kernel_size
    Co = params["w1"].shape[0]
    assert k == 2 * padding + 1, "residual add requires same-length ('same') conv"

    # lane/sublane-dense padded sizes
    Lp = _round_up(L, 128)
    Cip = _round_up(Ci, 8)
    Cop = _round_up(Co, 8)

    def pad_c(v, c):                       # (C,) -> (c, 1) f32 column
        return jnp.pad(v.astype(jnp.float32), (0, c - v.shape[0])).reshape(c, 1)

    def pad_w(w, co, ci):                  # (Co, Ci, k) -> (co, ci, k)
        return jnp.pad(w, ((0, co - w.shape[0]), (0, ci - w.shape[1]), (0, 0)))

    def im2col_w(w):                       # (Co, Ci, k) -> lane-dense (Co, k*Ci) bf16
        co, ci, kk = w.shape
        return w.transpose(0, 2, 1).reshape(co, kk * ci).astype(jnp.bfloat16)

    # fused (conv1 ++ gate) weights and affine params
    wa = im2col_w(jnp.concatenate(
        [pad_w(params["w1"], Cop, Cip), pad_w(params["wg"], Cop, Cip)], axis=0))
    ba = jnp.concatenate([pad_c(params["b1"], Cop), pad_c(params["bg"], Cop)], axis=0)
    ga = jnp.concatenate([pad_c(params["g1"], Cop), pad_c(params["gg"], Cop)], axis=0)
    bea = jnp.concatenate([pad_c(params["be1"], Cop), pad_c(params["beg"], Cop)], axis=0)

    # output conv
    wb = im2col_w(pad_w(params["w2"], Cip, Cop))
    bb = pad_c(params["b2"], Cip)
    gb = pad_c(params["g2"], Cip)
    beb = pad_c(params["be2"], Cip)

    # host pad input to dense tiles (zeros beyond L double as conv zero-padding)
    xp = jnp.pad(x.astype(jnp.float32), ((0, 0), (0, Cip - Ci), (0, Lp - L)))

    args = (xp, wa, ba, ga, bea, wb, bb, gb, beb)
    full = lambda a: pl.BlockSpec(a.shape, lambda b: (0,) * a.ndim)
    in_specs = ([pl.BlockSpec((1, Cip, Lp), lambda b: (b, 0, 0))]
                + [full(a) for a in args[1:]])

    kernel = functools.partial(residual_kernel, k=k, pad=padding, L=L, Cop=Cop)

    out = pl.pallas_call(
        kernel,
        out_shape=jax.ShapeDtypeStruct((B, Cip, Lp), x.dtype),
        grid_spec=pltpu.PrefetchScalarGridSpec(
            num_scalar_prefetch=0,
            grid=(B,),
            in_specs=in_specs,
            out_specs=pl.BlockSpec((1, Cip, Lp), lambda b: (b, 0, 0)),
        ),
        compiler_params=pltpu.CompilerParams(
            dimension_semantics=("parallel",)),
    )(*args)

    return out[:, :Ci, :L]


# ----------------------- plain-JAX reference (for checking) -----------------
def _conv1d_ref(x, w, b, pad):
    # same bf16-operand / f32-accumulation quantization as the kernel
    y = jax.lax.conv_general_dilated(
        x.astype(jnp.bfloat16), w.astype(jnp.bfloat16),
        window_strides=(1,), padding=[(pad, pad)],
        dimension_numbers=("NCH", "OIH", "NCH"),
        preferred_element_type=jnp.float32)
    return y + b[None, :, None]


def _inorm_ref(y, gamma, beta):
    mean = y.mean(axis=-1, keepdims=True)
    var = ((y - mean) ** 2).mean(axis=-1, keepdims=True)
    return (y - mean) / jnp.sqrt(var + EPS) * gamma[None, :, None] + beta[None, :, None]


def residual_layer_ref(x, p, *, padding):
    xf = x.astype(jnp.float32)
    h1 = _inorm_ref(_conv1d_ref(xf, p["w1"], p["b1"], padding), p["g1"], p["be1"])
    hg = _inorm_ref(_conv1d_ref(xf, p["wg"], p["bg"], padding), p["gg"], p["beg"])
    glu = h1 * jax.nn.sigmoid(hg)
    h2 = _inorm_ref(_conv1d_ref(glu, p["w2"], p["b2"], padding), p["g2"], p["be2"])
    return (xf + h2).astype(x.dtype)


if __name__ == "__main__":
    # small shapes consistent with the module: Conv1d over (B, C, L)
    B, Ci, Co, L = 2, 4, 8, 40
    kernel_size, stride, padding = 3, 1, 1  # "same" padding so residual add is valid

    key = jax.random.PRNGKey(0)
    ks = jax.random.split(key, 12)

    params = {
        # conv1d_layer: Conv1d(Ci->Co, k) + InstanceNorm1d(Co, affine)
        "w1": 0.1 * jax.random.normal(ks[0], (Co, Ci, kernel_size), jnp.float32),
        "b1": 0.1 * jax.random.normal(ks[1], (Co,), jnp.float32),
        "g1": 1.0 + 0.1 * jax.random.normal(ks[7], (Co,), jnp.float32),
        "be1": 0.1 * jax.random.normal(ks[8], (Co,), jnp.float32),
        # conv_layer_gates: Conv1d(Ci->Co, k) + InstanceNorm1d(Co, affine)
        "wg": 0.1 * jax.random.normal(ks[2], (Co, Ci, kernel_size), jnp.float32),
        "bg": 0.1 * jax.random.normal(ks[3], (Co,), jnp.float32),
        "gg": 1.0 + 0.1 * jax.random.normal(ks[9], (Co,), jnp.float32),
        "beg": 0.1 * jax.random.normal(ks[10], (Co,), jnp.float32),
        # conv1d_out_layer: Conv1d(Co->Ci, k) + InstanceNorm1d(Ci, affine)
        "w2": 0.1 * jax.random.normal(ks[4], (Ci, Co, kernel_size), jnp.float32),
        "b2": 0.1 * jax.random.normal(ks[5], (Ci,), jnp.float32),
        "g2": 1.0 + 0.1 * jax.random.normal(ks[11], (Ci,), jnp.float32),
        "be2": jnp.zeros((Ci,), jnp.float32),
    }

    x = jax.random.normal(ks[6], (B, Ci, L), jnp.float32)

    out = residual_layer(x, params, kernel_size=kernel_size, padding=padding)
    out = jax.block_until_ready(out)

    ref = residual_layer_ref(x, params, padding=padding)
    assert out.shape == (B, Ci, L)
    max_err = float(jnp.max(jnp.abs(out - ref)))
    assert jnp.allclose(out, ref, atol=1e-3, rtol=1e-3), f"max abs err {max_err}"

    print("KERNEL_OK")
</pallas_src>

<mosaic_0001>
module attributes {stable_mosaic.version = 11 : i64} {
  func.func @residual_kernel(%arg0: i32, %arg1: memref<1x8x128xf32, #tpu.memory_space<vmem>>, %arg2: memref<16x24xbf16, #tpu.memory_space<vmem>>, %arg3: memref<16x1xf32, #tpu.memory_space<vmem>>, %arg4: memref<16x1xf32, #tpu.memory_space<vmem>>, %arg5: memref<16x1xf32, #tpu.memory_space<vmem>>, %arg6: memref<8x24xbf16, #tpu.memory_space<vmem>>, %arg7: memref<8x1xf32, #tpu.memory_space<vmem>>, %arg8: memref<8x1xf32, #tpu.memory_space<vmem>>, %arg9: memref<8x1xf32, #tpu.memory_space<vmem>>, %arg10: memref<1x8x128xf32, #tpu.memory_space<vmem>>) attributes {dimension_semantics = [#tpu.dimension_semantics<parallel>], iteration_bounds = array<i64: 2>, scalar_prefetch = 0 : i64, scratch_operands = 0 : i64, tpu.core_type = #tpu.core_type<tc>, window_params = [{transform_indices = @transform_0, window_bounds = array<i64: 1, 8, 128>}, {pipeline_mode = #tpu.pipeline_mode<synchronous>, transform_indices = @transform_1, window_bounds = array<i64: 16, 24>}, {pipeline_mode = #tpu.pipeline_mode<synchronous>, transform_indices = @transform_2, window_bounds = array<i64: 16, 1>}, {pipeline_mode = #tpu.pipeline_mode<synchronous>, transform_indices = @transform_3, window_bounds = array<i64: 16, 1>}, {pipeline_mode = #tpu.pipeline_mode<synchronous>, transform_indices = @transform_4, window_bounds = array<i64: 16, 1>}, {pipeline_mode = #tpu.pipeline_mode<synchronous>, transform_indices = @transform_5, window_bounds = array<i64: 8, 24>}, {pipeline_mode = #tpu.pipeline_mode<synchronous>, transform_indices = @transform_6, window_bounds = array<i64: 8, 1>}, {pipeline_mode = #tpu.pipeline_mode<synchronous>, transform_indices = @transform_7, window_bounds = array<i64: 8, 1>}, {pipeline_mode = #tpu.pipeline_mode<synchronous>, transform_indices = @transform_8, window_bounds = array<i64: 8, 1>}, {transform_indices = @transform_9, window_bounds = array<i64: 1, 8, 128>}]} {
    %c0 = arith.constant 0 : index
    %c0_0 = arith.constant 0 : index
    %c0_1 = arith.constant 0 : index
    %0 = vector.load %arg1[%c0, %c0_0, %c0_1] : memref<1x8x128xf32, #tpu.memory_space<vmem>>, vector<1x8x128xf32>
    %1 = vector.shape_cast %0 : vector<1x8x128xf32> to vector<8x128xf32>
    %2 = tpu.iota {dimensions = array<i32: 1>} : vector<1x128xi32>
    %c40_i32 = arith.constant 40 : i32
    %3 = vector.broadcast %c40_i32 : i32 to vector<1x128xi32>
    %4 = arith.cmpi slt, %2, %3 : vector<1x128xi32>
    %5 = arith.extui %4 : vector<1x128xi1> to vector<1x128xi32>
    %6 = arith.sitofp %5 : vector<1x128xi32> to vector<1x128xf32>
    %cst = arith.constant 0.000000e+00 : f32
    %7 = vector.broadcast %cst : f32 to vector<8x1xf32>
    %8 = vector.extract_strided_slice %1 {offsets = [0, 0], sizes = [8, 127], strides = [1, 1]} : vector<8x128xf32> to vector<8x127xf32>
    %9 = tpu.concatenate %7, %8 in 1 : vector<8x1xf32>, vector<8x127xf32> -> vector<8x128xf32>
    %cst_2 = arith.constant 0.000000e+00 : f32
    %10 = vector.broadcast %cst_2 : f32 to vector<8x1xf32>
    %11 = vector.extract_strided_slice %1 {offsets = [0, 1], sizes = [8, 127], strides = [1, 1]} : vector<8x128xf32> to vector<8x127xf32>
    %12 = tpu.concatenate %11, %10 in 1 : vector<8x127xf32>, vector<8x1xf32> -> vector<8x128xf32>
    %13 = tpu.concatenate %9, %1, %12 in 0 : vector<8x128xf32>, vector<8x128xf32>, vector<8x128xf32> -> vector<24x128xf32>
    %14 = arith.truncf %13 : vector<24x128xf32> to vector<24x128xbf16>
    %c0_3 = arith.constant 0 : index
    %c0_4 = arith.constant 0 : index
    %15 = vector.load %arg2[%c0_3, %c0_4] : memref<16x24xbf16, #tpu.memory_space<vmem>>, vector<16x24xbf16>
    %cst_5 = arith.constant dense<0.000000e+00> : vector<16x128xf32>
    %16 = tpu.matmul %15, %14, %cst_5 {dimension_numbers = #tpu.dot_dimension_numbers<[1], [0], [0], [1], [0, 0, 1, 1], [], []>} : vector<16x24xbf16>, vector<24x128xbf16>, vector<16x128xf32> -> vector<16x128xf32>
    %c0_6 = arith.constant 0 : index
    %c0_7 = arith.constant 0 : index
    %17 = vector.load %arg3[%c0_6, %c0_7] : memref<16x1xf32, #tpu.memory_space<vmem>>, vector<16x1xf32>
    %18 = vector.broadcast %17 : vector<16x1xf32> to vector<16x128xf32>
    %19 = arith.addf %16, %18 : vector<16x128xf32>
    %c0_8 = arith.constant 0 : index
    %c0_9 = arith.constant 0 : index
    %20 = vector.load %arg4[%c0_8, %c0_9] : memref<16x1xf32, #tpu.memory_space<vmem>>, vector<16x1xf32>
    %c0_10 = arith.constant 0 : index
    %c0_11 = arith.constant 0 : index
    %21 = vector.load %arg5[%c0_10, %c0_11] : memref<16x1xf32, #tpu.memory_space<vmem>>, vector<16x1xf32>
    %22 = vector.broadcast %6 : vector<1x128xf32> to vector<16x128xf32>
    %23 = arith.mulf %19, %22 : vector<16x128xf32>
    %cst_12 = arith.constant dense<0.000000e+00> : vector<16xf32>
    %24 = vector.multi_reduction <add>, %23, %cst_12 [1] : vector<16x128xf32> to vector<16xf32>
    %25 = vector.shape_cast %24 : vector<16xf32> to vector<16x1xf32>
    %26 = arith.mulf %23, %23 : vector<16x128xf32>
    %cst_13 = arith.constant dense<0.000000e+00> : vector<16xf32>
    %27 = vector.multi_reduction <add>, %26, %cst_13 [1] : vector<16x128xf32> to vector<16xf32>
    %28 = vector.shape_cast %27 : vector<16xf32> to vector<16x1xf32>
    %cst_14 = arith.constant 2.500000e-02 : f32
    %29 = vector.broadcast %cst_14 : f32 to vector<16x1xf32>
    %30 = arith.mulf %25, %29 : vector<16x1xf32>
    %cst_15 = arith.constant 2.500000e-02 : f32
    %31 = vector.broadcast %cst_15 : f32 to vector<16x1xf32>
    %32 = arith.mulf %28, %31 : vector<16x1xf32>
    %33 = arith.mulf %30, %30 : vector<16x1xf32>
    %34 = arith.subf %32, %33 : vector<16x1xf32>
    %cst_16 = arith.constant 0.000000e+00 : f32
    %35 = vector.broadcast %cst_16 : f32 to vector<16x1xf32>
    %36 = arith.maximumf %34, %35 : vector<16x1xf32>
    %37 = vector.broadcast %30 : vector<16x1xf32> to vector<16x128xf32>
    %38 = arith.subf %19, %37 : vector<16x128xf32>
    %cst_17 = arith.constant 9.99999974E-6 : f32
    %39 = vector.broadcast %cst_17 : f32 to vector<16x1xf32>
    %40 = arith.addf %36, %39 : vector<16x1xf32>
    %41 = math.rsqrt %40 : vector<16x1xf32>
    %42 = vector.broadcast %41 : vector<16x1xf32> to vector<16x128xf32>
    %43 = arith.mulf %38, %42 : vector<16x128xf32>
    %44 = vector.broadcast %20 : vector<16x1xf32> to vector<16x128xf32>
    %45 = arith.mulf %43, %44 : vector<16x128xf32>
    %46 = vector.broadcast %21 : vector<16x1xf32> to vector<16x128xf32>
    %47 = arith.addf %45, %46 : vector<16x128xf32>
    %48 = vector.extract_strided_slice %47 {offsets = [0, 0], sizes = [8, 128], strides = [1, 1]} : vector<16x128xf32> to vector<8x128xf32>
    %49 = vector.extract_strided_slice %47 {offsets = [8, 0], sizes = [8, 128], strides = [1, 1]} : vector<16x128xf32> to vector<8x128xf32>
    %50 = arith.negf %49 : vector<8x128xf32>
    %51 = math.exp %50 : vector<8x128xf32>
    %cst_18 = arith.constant 1.000000e+00 : f32
    %52 = vector.broadcast %cst_18 : f32 to vector<8x128xf32>
    %53 = arith.addf %52, %51 : vector<8x128xf32>
    %54 = arith.divf %52, %53 : vector<8x128xf32>
    %55 = arith.mulf %48, %54 : vector<8x128xf32>
    %56 = vector.broadcast %6 : vector<1x128xf32> to vector<8x128xf32>
    %57 = arith.mulf %55, %56 : vector<8x128xf32>
    %cst_19 = arith.constant 0.000000e+00 : f32
    %58 = vector.broadcast %cst_19 : f32 to vector<8x1xf32>
    %59 = vector.extract_strided_slice %57 {offsets = [0, 0], sizes = [8, 127], strides = [1, 1]} : vector<8x128xf32> to vector<8x127xf32>
    %60 = tpu.concatenate %58, %59 in 1 : vector<8x1xf32>, vector<8x127xf32> -> vector<8x128xf32>
    %cst_20 = arith.constant 0.000000e+00 : f32
    %61 = vector.broadcast %cst_20 : f32 to vector<8x1xf32>
    %62 = vector.extract_strided_slice %57 {offsets = [0, 1], sizes = [8, 127], strides = [1, 1]} : vector<8x128xf32> to vector<8x127xf32>
    %63 = tpu.concatenate %62, %61 in 1 : vector<8x127xf32>, vector<8x1xf32> -> vector<8x128xf32>
    %64 = tpu.concatenate %60, %57, %63 in 0 : vector<8x128xf32>, vector<8x128xf32>, vector<8x128xf32> -> vector<24x128xf32>
    %65 = arith.truncf %64 : vector<24x128xf32> to vector<24x128xbf16>
    %c0_21 = arith.constant 0 : index
    %c0_22 = arith.constant 0 : index
    %66 = vector.load %arg6[%c0_21, %c0_22] : memref<8x24xbf16, #tpu.memory_space<vmem>>, vector<8x24xbf16>
    %cst_23 = arith.constant dense<0.000000e+00> : vector<8x128xf32>
    %67 = tpu.matmul %66, %65, %cst_23 {dimension_numbers = #tpu.dot_dimension_numbers<[1], [0], [0], [1], [0, 0, 1, 1], [], []>} : vector<8x24xbf16>, vector<24x128xbf16>, vector<8x128xf32> -> vector<8x128xf32>
    %c0_24 = arith.constant 0 : index
    %c0_25 = arith.constant 0 : index
    %68 = vector.load %arg7[%c0_24, %c0_25] : memref<8x1xf32, #tpu.memory_space<vmem>>, vector<8x1xf32>
    %69 = vector.broadcast %68 : vector<8x1xf32> to vector<8x128xf32>
    %70 = arith.addf %67, %69 : vector<8x128xf32>
    %c0_26 = arith.constant 0 : index
    %c0_27 = arith.constant 0 : index
    %71 = vector.load %arg8[%c0_26, %c0_27] : memref<8x1xf32, #tpu.memory_space<vmem>>, vector<8x1xf32>
    %c0_28 = arith.constant 0 : index
    %c0_29 = arith.constant 0 : index
    %72 = vector.load %arg9[%c0_28, %c0_29] : memref<8x1xf32, #tpu.memory_space<vmem>>, vector<8x1xf32>
    %73 = vector.broadcast %6 : vector<1x128xf32> to vector<8x128xf32>
    %74 = arith.mulf %70, %73 : vector<8x128xf32>
    %cst_30 = arith.constant dense<0.000000e+00> : vector<8xf32>
    %75 = vector.multi_reduction <add>, %74, %cst_30 [1] : vector<8x128xf32> to vector<8xf32>
    %76 = vector.shape_cast %75 : vector<8xf32> to vector<8x1xf32>
    %77 = arith.mulf %74, %74 : vector<8x128xf32>
    %cst_31 = arith.constant dense<0.000000e+00> : vector<8xf32>
    %78 = vector.multi_reduction <add>, %77, %cst_31 [1] : vector<8x128xf32> to vector<8xf32>
    %79 = vector.shape_cast %78 : vector<8xf32> to vector<8x1xf32>
    %cst_32 = arith.constant 2.500000e-02 : f32
    %80 = vector.broadcast %cst_32 : f32 to vector<8x1xf32>
    %81 = arith.mulf %76, %80 : vector<8x1xf32>
    %cst_33 = arith.constant 2.500000e-02 : f32
    %82 = vector.broadcast %cst_33 : f32 to vector<8x1xf32>
    %83 = arith.mulf %79, %82 : vector<8x1xf32>
    %84 = arith.mulf %81, %81 : vector<8x1xf32>
    %85 = arith.subf %83, %84 : vector<8x1xf32>
    %cst_34 = arith.constant 0.000000e+00 : f32
    %86 = vector.broadcast %cst_34 : f32 to vector<8x1xf32>
    %87 = arith.maximumf %85, %86 : vector<8x1xf32>
    %88 = vector.broadcast %81 : vector<8x1xf32> to vector<8x128xf32>
    %89 = arith.subf %70, %88 : vector<8x128xf32>
    %cst_35 = arith.constant 9.99999974E-6 : f32
    %90 = vector.broadcast %cst_35 : f32 to vector<8x1xf32>
    %91 = arith.addf %87, %90 : vector<8x1xf32>
    %92 = math.rsqrt %91 : vector<8x1xf32>
    %93 = vector.broadcast %92 : vector<8x1xf32> to vector<8x128xf32>
    %94 = arith.mulf %89, %93 : vector<8x128xf32>
    %95 = vector.broadcast %71 : vector<8x1xf32> to vector<8x128xf32>
    %96 = arith.mulf %94, %95 : vector<8x128xf32>
    %97 = vector.broadcast %72 : vector<8x1xf32> to vector<8x128xf32>
    %98 = arith.addf %96, %97 : vector<8x128xf32>
    %99 = arith.addf %1, %98 : vector<8x128xf32>
    %c0_36 = arith.constant 0 : index
    %c0_37 = arith.constant 0 : index
    %c0_38 = arith.constant 0 : index
    %100 = vector.load %arg10[%c0_36, %c0_37, %c0_38] : memref<1x8x128xf32, #tpu.memory_space<vmem>>, vector<1x8x128xf32>
    %101 = vector.shape_cast %100 : vector<1x8x128xf32> to vector<8x128xf32>
    %102 = vector.shape_cast %99 : vector<8x128xf32> to vector<1x8x128xf32>
    tpu.vector_store %arg10[%c0_36, %c0_37, %c0_38], %102 {strides = array<i32>} : memref<1x8x128xf32, #tpu.memory_space<vmem>>, vector<1x8x128xf32>,
    return
  }
  func.func @transform_0(%arg0: i32) -> (i32, i32, i32) {
    %c0_i32 = arith.constant 0 : i32
    %c0_i32_0 = arith.constant 0 : i32
    %c0_i32_1 = arith.constant 0 : i32
    return %arg0, %c0_i32, %c0_i32_0 : i32, i32, i32
  }
  func.func @transform_1(%arg0: i32) -> (i32, i32) {
    %c0_i32 = arith.constant 0 : i32
    %c0_i32_0 = arith.constant 0 : i32
    %c0_i32_1 = arith.constant 0 : i32
    return %c0_i32, %c0_i32_0 : i32, i32
  }
  func.func @transform_2(%arg0: i32) -> (i32, i32) {
    %c0_i32 = arith.constant 0 : i32
    %c0_i32_0 = arith.constant 0 : i32
    %c0_i32_1 = arith.constant 0 : i32
    return %c0_i32, %c0_i32_0 : i32, i32
  }
  func.func @transform_3(%arg0: i32) -> (i32, i32) {
    %c0_i32 = arith.constant 0 : i32
    %c0_i32_0 = arith.constant 0 : i32
    %c0_i32_1 = arith.constant 0 : i32
    return %c0_i32, %c0_i32_0 : i32, i32
  }
  func.func @transform_4(%arg0: i32) -> (i32, i32) {
    %c0_i32 = arith.constant 0 : i32
    %c0_i32_0 = arith.constant 0 : i32
    %c0_i32_1 = arith.constant 0 : i32
    return %c0_i32, %c0_i32_0 : i32, i32
  }
  func.func @transform_5(%arg0: i32) -> (i32, i32) {
    %c0_i32 = arith.constant 0 : i32
    %c0_i32_0 = arith.constant 0 : i32
    %c0_i32_1 = arith.constant 0 : i32
    return %c0_i32, %c0_i32_0 : i32, i32
  }
  func.func @transform_6(%arg0: i32) -> (i32, i32) {
    %c0_i32 = arith.constant 0 : i32
    %c0_i32_0 = arith.constant 0 : i32
    %c0_i32_1 = arith.constant 0 : i32
    return %c0_i32, %c0_i32_0 : i32, i32
  }
  func.func @transform_7(%arg0: i32) -> (i32, i32) {
    %c0_i32 = arith.constant 0 : i32
    %c0_i32_0 = arith.constant 0 : i32
    %c0_i32_1 = arith.constant 0 : i32
    return %c0_i32, %c0_i32_0 : i32, i32
  }
  func.func @transform_8(%arg0: i32) -> (i32, i32) {
    %c0_i32 = arith.constant 0 : i32
    %c0_i32_0 = arith.constant 0 : i32
    %c0_i32_1 = arith.constant 0 : i32
    return %c0_i32, %c0_i32_0 : i32, i32
  }
  func.func @transform_9(%arg0: i32) -> (i32, i32, i32) {
    %c0_i32 = arith.constant 0 : i32
    %c0_i32_0 = arith.constant 0 : i32
    %c0_i32_1 = arith.constant 0 : i32
    return %arg0, %c0_i32, %c0_i32_0 : i32, i32, i32
  }
}

</mosaic_0001>

<bundles_post_ra>
// kernel: tpu_custom_call.1
= control target key start
LH: loop header
LB: loop body
LE: loop exit
PB: predicated region body
PF: predicated region fallthrough
CT: control target
= control target key end

     0   :  { %14 = vsyncpa [#allocation3], 0  ;;  %s1044_s0 = inlined_call_operand.vmem [shape: f32[2,8,128], index: 0, kind: input, shape index: {}]   ;;  %s1045_s1 = inlined_call_operand.vmem [shape: bf16[16,24], index: 1, kind: input, shape index: {}]   ;;  %s1046_s2 = inlined_call_operand.vmem [shape: f32[16,1], index: 2, kind: input, shape index: {}]   ;;  %s1047_s3 = inlined_call_operand.vmem [shape: f32[16,1], index: 3, kind: input, shape index: {}]   ;;  %s1048_s4 = inlined_call_operand.vmem [shape: f32[16,1], index: 4, kind: input, shape index: {}]   ;;  %s1049_s5 = inlined_call_operand.vmem [shape: bf16[8,24], index: 5, kind: input, shape index: {}]   ;;  %s1050_s6 = inlined_call_operand.vmem [shape: f32[8,1], index: 6, kind: input, shape index: {}]   ;;  %s1051_s7 = inlined_call_operand.vmem [shape: f32[8,1], index: 7, kind: input, shape index: {}]   ;;  %s1052_s8 = inlined_call_operand.vmem [shape: f32[8,1], index: 8, kind: input, shape index: {}]   ;;  %s1053_s9 = inlined_call_operand.hbm [shape: f32[2,8,128], index: 9, kind: output, shape index: {}]  }
   0x1   :  { %16 = vsyncpa [#allocation3 + $0x1], 0  ;;  %s874_s30 = smov 0   ;;  %s876_s10 = smov 0  }
   0x2   :  { %s878_s11 = smov 0   ;;  %s880_s12 = smov 0  }
   0x3 LB: > { %s895_s13 = sadd.s32 4294967295, %s815_s12   ;;  %s650_s14 = sadd.s32 4294967294, %s815_s12   ;;  %s815_s12 = sphi %s880_s12, %s1061_s12   ;;  %s811_s11 = sphi %s878_s11, %s1060_s11   ;;  %s807_s10 = sphi %s876_s10, %s1059_s10   ;;  %s803_s30 = sphi %s874_s30, %s1058_s30  }
   0x4   : > { %s899_s15 = sadd.s32 1, %s815_s12   ;;  %s223_s16 = sadd.s32 1, %s811_s11 }
   0x5   : > { %s220_s17 = ssub.s32 %s815_s12, %s899_s15  ;;  %p233_p0 = scmp.ne.s32.totalorder %s811_s11, %s807_s10 }
   0x6   : > { %p221_p1 = scmp.eq.s32.totalorder %s220_s17, 0  ;;  %p234_p2 = scmp.eq.s32.totalorder %s895_s13, 1 }
   0x7   : > { %p239_p3 = scmp.ne.s32.totalorder %s807_s10, %s803_s30  ;;  %p240_p4 = scmp.eq.s32.totalorder %s650_s14, 1 }
   0x8   : > { %s910_s18 = scalar_select %p221_p1, %s811_s11, %s223_s16  }
   0x9   : > { %p912_p5 = por %p234_p2, %p233_p0  ;;  %p916_p6 = por %p240_p4, %p239_p3 }
   0xa   : > { %p653_p7 = scmp.ge.s32.totalorder %s815_s12, 1  ;;  %p289_p8 = scmp.lt.s32.totalorder %s815_s12, 3 }
   0xc   : > { %p290_p9 = pnand %p653_p7, %p289_p8 }
   0xd   : > { %p324_p10 = scmp.lt.s32.totalorder (!%p290_p9), %s895_s13, 1  ;;  %v817_v0 = vmov (!%p290_p9), 0.0   ;;  %vm818_vm0 = vmmov (!%p290_p9), 0   ;;  %v351_v1 = vld [vmem:[%s1046_s2 + $0x8] sm:$0xff] (!%p290_p9)  ;;  %v819_v3 = vmov (!%p290_p9), 0   ;;  %s820_s28 = smov (!%p290_p9), 1   ;;  %v330_v13 = vlaneseq (!%p290_p9) }
   0xe   : > { %293 = sbr.rel (%p290_p9) target bundleno = 1098 (0x44a), region = 56  ;;  %679 = vmatprep.subr.bf16.mxu0 (!%p290_p9), %v817_v0  ;;  %687 = vmatprep.subr.bf16.mxu1 (!%p290_p9), %v817_v0  ;;  %v350_v4 = vld [vmem:[%s1046_s2] sm:$0xff] (!%p290_p9)  ;;  %s821_s16 = smov (!%p290_p9), 127   ;;  %vm339_vm1 = vcmask (!%p290_p9), 7168   ;;  %vm822_vm3 = vmmov (!%p290_p9), 1   ;;  %vm344_vm5 = vcmask (!%p290_p9), 1039360  }
   0xf   : > { %683 = vmatprep.mubr.msk.bf16.mxu0 (!%p290_p9), %vm818_vm0, %v817_v0  ;;  %691 = vmatprep.mubr.msk.bf16.mxu1 (!%p290_p9), %vm818_vm0, %v817_v0  ;;  %vm658_vm2 = vmneg (!%p290_p9), %vm339_vm1  ;;  %vm371_vm6 = vcmask (!%p290_p9), 1043456   ;;  %v742_v12 = vld [vmem:[%s1045_s1] sm:$0xff] (!%p290_p9)   ;;  %vm367_vm7 = vcmask (!%p290_p9), 195584   ;;  %v331_v14 = vand.u32 (!%p290_p9), 127, %v330_v13  ;;  %v417_v28 = vld [vmem:[%s1047_s3 + $0x8] sm:$0xff] (!%p290_p9)  ;;  %s321_s26 = sand.u32 (!%p290_p9), 1, %s807_s10  }
  0x10   : > { %740 = vset.pattern.permute.xlu1 (!%p290_p9), %v819_v3  ;;  %741 = vset.pattern.permute.xlu0 (!%p290_p9), %v819_v3  ;;  %vm943_vm4 = vmpackc.low (!%p290_p9), %vm822_vm3, %vm658_vm2  ;;  %v416_v29 = vld [vmem:[%s1047_s3] sm:$0xff] (!%p290_p9)  ;;  %v419_v31 = vld [vmem:[%s1048_s4 + $0x8] sm:$0xff] (!%p290_p9)  ;;  %s654_s27 = sshll.u32 (!%p290_p9), %s321_s26, 3  ;;  %s670_s29 = sshll.u32 (!%p290_p9), %s895_s13, 7 }
  0x11   : > { %359 = vperm.xlu1 (!%p290_p9), %740, %v351_v1   ;;  %vm332_vm8 = vcmp.lt.s32.totalorder (!%p290_p9), %v331_v14, 40  ;;  %v418_v30 = vld [vmem:[%s1048_s4] sm:$0xff] (!%p290_p9)  ;;  %s323_s14 = scalar_lea.vmem (!%p290_p9), [#allocation2], %s654_s27 }
  0x12   : > { %v958_v18 = vsel (!%p290_p9), %vm332_vm8, 1.0, %v817_v0  ;;  %v493_v14 = vld [vmem:[%s1049_s5] sm:$0xf] (!%p290_p9)  ;;  %s591_s17 = sshll.u32 (!%p290_p9), %s323_s14, 4  ;;  %s1004_s17 = int_to_ptr.vmem [resolvable:$true] %s591_s17 }
  0x13   : > { %s753_s23 = scalar_lea.vmem (!%p290_p9), %s1004_s17, 128 }
  0x14   : > { %p754_p11 = scmp.ne.s32.totalorder (!%p290_p9), %s1004_s17, %s753_s23 }
  0x15   : > { %s325_s21 = scalar_select %p324_p10, %s895_s13, 1  ;;  %354 = vperm.xlu1 %740, %v350_v4  }
  0x16   : > { %p755_p12 = pnand %p754_p11, %p912_p5  ;;  %s823_s13 = smov [#allocation2]  }
  0x17   : > { %s655_s22 = sshll.u32 %s325_s21, 3  ;;  %s757_s24 = sshll.u32 %s823_s13, 4  ;;  %s758_s24 = int_to_ptr.vmem [resolvable:$false] %s757_s24 }
  0x18   : > { %s327_s25 = scalar_lea.vmem %s1044_s0, %s655_s22  ;;  %s578_s22 = scalar_lea.sflag [#allocation3], %s321_s26 }
  0x19   : > { %v934_v2 = vld [vmem:[%s327_s25] sm:$0xff]  ;;  %p756_p13 = pneg %p755_p12  ;;  %s759_s25 = scalar_lea.vmem %s758_s24, 256 }
  0x1a   : > { %336 = vrot.lane.b32.xlu0 %v934_v2, %s820_s28  ;;  %p760_p0 = scmp.lt.s32.totalorder %s1004_s17, %s758_s24  ;;  %p761_p1 = scmp.lt.s32.totalorder %s759_s25, %s753_s23 }
  0x1c   : > { %p762_p2 = por %p761_p1, %p760_p0 }
  0x1e   : > { %341 = vrot.lane.b32.xlu0 %v934_v2, %s821_s16  ;;  %p763_p3 = pnand %p762_p2, %p756_p13 }
  0x8c   : > { %v337_v5 = vpop.permute.xlu0 %336 }
  0x8d   : > { %v660_v7 = vpack.c.bf16 %v934_v2, %v337_v5 }
  0x8f   : > { %680 = vmatpush3.bf16.msk.msra.mxu0 %vm943_vm4, %v660_v7  ;;  %v494_v7 = vld [vmem:[%s1050_s6] sm:$0xff] }
  0x90   : > { %v342_v8 = vpop.permute.xlu0 %341  ;;  %681 = vmatprep.subr.bf16.mxu0 %v817_v0  ;;  %v360_v15 = vpop.permute.xlu1 %359 }
  0x91   : > { %v345_v9 = vsel %vm344_vm5, %v342_v8, 0.0 }
  0x92   : > { %v347_v10 = vpack.c.bf16 %v345_v9, %v345_v9 }
  0x94   : > { %v373_v11 = vsel %vm371_vm6, %v347_v10, 0  ;;  %v355_v16 = vpop.permute.xlu1 %354 }
  0x95   : > { %682 = vmatpush3.bf16.msra.mxu0 %v373_v11 }
  0x98   : > { %684 = vmatmul.mubr.msk.bf16.vlgmr.msra.gmra.mrb[0].mxu0 %vm367_vm7, %v742_v12 }
 0x16b   : > { %v409_v17 = vpop.f32.mrb[0].mxu0 }
 0x16c   : > { %v410_v19 = vadd.f32 %v409_v17, %v355_v16  ;;  %v685_v20 = vpop.f32.mrb[1].mxu0 }
 0x16d   : > { %v412_v21 = vpop.f32.mrb[2].mxu0 }
 0x16e   : > { %v413_v22 = vadd.f32 %v412_v21, %v360_v15  ;;  %v686_v23 = vpop.f32.mrb[3].mxu0  ;;  %v420_v24 = vmul.f32 %v958_v18, %v410_v19 }
 0x16f   : > { %v547_v23 = vld [vmem:[%s1052_s8] sm:$0xff] }
 0x170   : > { %422 = vadd.xlane.f32.xlu0 %v420_v24  ;;  %v421_v25 = vmul.f32 %v958_v18, %v413_v22  ;;  %v426_v27 = vmul.f32 %v420_v24, %v420_v24 }
 0x172   : > { %v427_v26 = vmul.f32 %v421_v25, %v421_v25 }
 0x174   : > { %424 = vadd.xlane.f32.xlu0 %v421_v25  ;;  %430 = vadd.xlane.f32.xlu1 %v427_v26 }
 0x178   : > { %428 = vadd.xlane.f32.xlu0 %v426_v27 }
 0x185   : > { %457 = vperm.xlu1 %740, %v417_v28  }
 0x189   : > { %452 = vperm.xlu1 %740, %v416_v29  }
 0x18d   : > { %464 = vperm.xlu1 %740, %v418_v30  }
 0x18e   : > { %469 = vperm.xlu0 %741, %v419_v31  }
 0x1fd   : > { %v423_v32 = vpop.xlane.xlu0 %422 }
 0x1fe   : > { %v432_v42 = vmul.f32 0.025, %v423_v32 }
 0x200   : > { %v436_v44 = vmul.f32 %v432_v42, %v432_v42  ;;  %v442_v59 = vsub.f32 %v410_v19, %v432_v42 }
 0x201   : > { %v425_v33 = vpop.xlane.xlu0 %424  ;;  %v431_v34 = vpop.xlane.xlu1 %430 }
 0x202   : > { %v433_v35 = vmul.f32 0.025, %v425_v33  ;;  %v435_v37 = vmul.f32 0.025, %v431_v34 }
 0x204   : > { %v437_v36 = vmul.f32 %v433_v35, %v433_v35  ;;  %v443_v46 = vsub.f32 %v413_v22, %v433_v35  ;;  %v546_v22 = vld [vmem:[%s1051_s7] sm:$0xff] }
 0x205   : > { %v429_v41 = vpop.xlane.xlu0 %428  ;;  %v458_v50 = vpop.permute.xlu1 %457 }
 0x206   : > { %v439_v38 = vsub.f32 %v435_v37, %v437_v36  ;;  %v434_v43 = vmul.f32 0.025, %v429_v41 }
 0x208   : > { %v441_v39 = vmax.f32 %v439_v38, 0.0  ;;  %v438_v45 = vsub.f32 %v434_v43, %v436_v44 }
 0x209   : > { %v453_v61 = vpop.permute.xlu1 %452 }
 0x20a   : > { %v445_v40 = vadd.f32 1e-05, %v441_v39  ;;  %v440_v49 = vmax.f32 %v438_v45, 0.0 }
 0x20c   : > { %743 = vrsqrt.f32 %v445_v40  ;;  %v444_v54 = vadd.f32 1e-05, %v440_v49 }
 0x20d   : > { %v470_v51 = vpop.permute.xlu0 %469  ;;  %v465_v63 = vpop.permute.xlu1 %464 }
 0x216   : > { %v744_v47 = vpop.eup %743 }
 0x217   : > { %v449_v48 = vmul.f32 %v744_v47, %v443_v46 }
 0x219   : > { %v461_v52 = vmul.f32 %v458_v50, %v449_v48 }
 0x21b   : > { %v473_v53 = vadd.f32 %v470_v51, %v461_v52 }
 0x21d   : > { %v663_v55 = vmul.f32 -1.442695, %v473_v53 }
 0x21f   : > { %745 = vpow2.f32 %v663_v55 }
 0x220   : > { %747 = vrsqrt.f32 %v444_v54 }
 0x229   : > { %v746_v56 = vpop.eup %745 }
 0x22a   : > { %v748_v57 = vpop.eup %747  ;;  %v477_v58 = vadd.f32 1.0, %v746_v56 }
 0x22b   : > { %v448_v60 = vmul.f32 %v748_v57, %v442_v59 }
 0x22c   : > { %749 = vrcp.f32 %v477_v58 }
 0x22d   : > { %v460_v62 = vmul.f32 %v453_v61, %v448_v60 }
 0x22f   : > { %v472_v1 = vadd.f32 %v465_v63, %v460_v62 }
 0x236   : > { %v750_v3 = vpop.eup %749 }
 0x237   : > { %v480_v4 = vmul.f32 %v750_v3, %v472_v1 }
 0x239   : > { %v481_v5 = vmul.f32 %v958_v18, %v480_v4 }
 0x23b   : > { %483 = vrot.lane.b32.xlu1 %v481_v5, %s820_s28 }
 0x23f   : > { %487 = vrot.lane.b32.xlu1 %v481_v5, %s821_s16  ;;  %s1002_s16 = scalar_lea.hbm %s1053_s9, %s670_s29 }
 0x243   : > { %497 = vperm.xlu1 %740, %v494_v7  }
 0x2ad   : > { %v484_v8 = vpop.permute.xlu1 %483 }
 0x2ae   : > { %v666_v9 = vpack.c.bf16 %v481_v5, %v484_v8 }
 0x2b0   : > { %688 = vmatpush3.bf16.msk.msra.mxu1 %vm943_vm4, %v666_v9 }
 0x2b1   : > { %v488_v10 = vpop.permute.xlu1 %487  ;;  %689 = vmatprep.subr.bf16.mxu1 %v817_v0 }
 0x2b2   : > { %v490_v11 = vsel %vm344_vm5, %v488_v10, 0.0 }
 0x2b3   : > { %v492_v12 = vpack.c.bf16 %v490_v11, %v490_v11 }
 0x2b5   : > { %v504_v13 = vsel %vm371_vm6, %v492_v12, 0 }
 0x2b6   : > { %690 = vmatpush3.bf16.msra.mxu1 %v504_v13 }
 0x2b9   : > { %692 = vmatmul.mubr.msk.bf16.vlgmr.msra.gmra.mrb[0].mxu1 %vm367_vm7, %v493_v14 }
 0x2c2   : > { %v498_v15 = vpop.permute.xlu1 %497 }
 0x38c   : > { %v540_v16 = vpop.f32.mrb[0].mxu1 }
 0x38d   : > { %v541_v17 = vadd.f32 %v540_v16, %v498_v15  ;;  %v693_v6 = vpop.f32.mrb[1].mxu1 }
 0x38e   : > { %v543_v19 = vpop.f32.mrb[2].mxu1 }
 0x38f   : > { %v694_v20 = vpop.f32.mrb[3].mxu1  ;;  %v548_v0 = vmul.f32 %v958_v18, %v541_v17 }
 0x391   : > { %549 = vadd.xlane.f32.xlu1 %v548_v0  ;;  %v551_v21 = vmul.f32 %v548_v0, %v548_v0 }
 0x393   : > { %552 = vadd.xlane.f32.xlu0 %v551_v21 }
 0x3a2   : > { %565 = vperm.xlu1 %740, %v546_v22  }
 0x3a9   : > { %571 = vperm.xlu0 %741, %v547_v23  }
 0x41e   : > { %v550_v24 = vpop.xlane.xlu1 %549 }
 0x41f   : > { %v554_v25 = vmul.f32 0.025, %v550_v24 }
 0x420   : > { %v553_v26 = vpop.xlane.xlu0 %552 }
 0x421   : > { %v556_v27 = vmul.f32 %v554_v25, %v554_v25  ;;  %v555_v18 = vmul.f32 0.025, %v553_v26  ;;  %v559_v31 = vsub.f32 %v541_v17, %v554_v25 }
 0x422   : > { %v566_v34 = vpop.permute.xlu1 %565 }
 0x423   : > { %v557_v28 = vsub.f32 %v555_v18, %v556_v27 }
 0x425   : > { %v558_v29 = vmax.f32 %v557_v28, 0.0 }
 0x427   : > { %v560_v30 = vadd.f32 1e-05, %v558_v29 }
 0x428   : > { %v572_v36 = vpop.permute.xlu0 %571 }
 0x429   : > { %751 = vrsqrt.f32 %v560_v30 }
 0x433   : > { %v752_v32 = vpop.eup %751 }
 0x434   : > { %v562_v33 = vmul.f32 %v752_v32, %v559_v31 }
 0x436   : > { %v568_v35 = vmul.f32 %v566_v34, %v562_v33 }
 0x438   : > { %v574_v37 = vadd.f32 %v572_v36, %v568_v35 }
 0x43a   : > { %v575_v38 = vadd.f32 %v574_v37, %v934_v2 }
 0x43c   : > { %576 = vst [vmem:[%s323_s14] sm:$0xff] %v575_v38 }
 0x43d   : > { %766 = shalt.err (!%p763_p3)
}
 0x43e   : > { %s767_s26 = scalar_lea.hbm %s1002_s16, 128  ;;  %s771_s14 = scalar_lea.hbm %s1053_s9, 256 }
 0x43f   : > { %p768_p4 = scmp.ne.s32.totalorder %s1002_s16, %s767_s26  ;;  %p772_p9 = scmp.lt.u32.totalorder %s1002_s16, %s1053_s9 }
 0x440   : > { %p773_p10 = scmp.lt.u32.totalorder %s771_s14, %s767_s26  ;;  %p775_p12 = scmp.lt.u32.totalorder %s767_s26, %s1002_s16 }
 0x441   : > { %p769_p7 = pnand %p768_p4, %p912_p5 }
 0x442   : > { %p774_p11 = por %p773_p10, %p772_p9 }
 0x443   : > { %p770_p8 = pneg %p769_p7 }
 0x444   : > { %p776_p13 = por %p775_p12, %p774_p11 }
 0x446   : > { %p777_p0 = pnand %p776_p13, %p770_p8 }
 0x448   : > { %780 = shalt.err (!%p777_p0)
}
 0x449   : > { %695 = dma.vmem_to_hbm [thread:$0]  (%p912_p5), %s1004_s17, 128, %s1002_s16, %s578_s22  }
 0x44a PF: > { %p701_p1 = scmp.ge.s32.totalorder %s815_s12, 2  ;;  %s603_s23 = sand.u32 1, %s803_s30  }
 0x44b   : > { %s604_s13 = scalar_lea.sflag [#allocation3], %s603_s23 }
 0x44c   : > { %p698_p2 = pnand %p701_p1, %p916_p6 }
 0x44e   : > { %798 = dma.done.wait (!%p698_p2), %s604_s13, 128  }
 0x44f   : > { %800 = vsyncadd (!%p698_p2), %s604_s13, 4294967168  ;;  %p19_p3 = scmp.ge.s32.totalorder %s899_s15, 4   ;;  %s1058_s30 = smov %s807_s10 }
 0x450   : > { %s1059_s10 = smov %s811_s11  ;;  %s1060_s11 = smov %s910_s18 }
 0x451   : > { %s1061_s12 = smov %s899_s15  ;;  %21 = sbr.rel (!%p19_p3) target bundleno = 3 (0x3), region = 91 }
 0x458   :  { %609 = vsyncpa [#allocation3], 1 }
 0x459   :  { %611 = vsyncpa [#allocation3 + $0x1], 1 }

</bundles_post_ra>
